<compile_context>
chip_gen: v6e
topology: v6e:2x2x1
jax: 0.10.0
libtpu: 0.0.40
codegen_flags: <defaults>
</compile_context>

<pallas_src>
import jax
import jax.numpy as jnp
from jax import lax
from jax.experimental import pallas as pl
from jax.experimental.pallas import tpu as pltpu


def _cdiv(a: int, b: int) -> int:
    return -(-a // b)


def _round_up(n: int, m: int) -> int:
    return ((n + m - 1) // m) * m


def _default_vmem_limit() -> int:
    """~Half of per-core VMEM: ~32 MiB on v7x (64 MiB/core), ~64 MiB on v5e/v6e."""
    try:
        cap = pltpu.get_tpu_info().vmem_capacity_bytes
        return int(min(max(cap // 2, 16 * 1024 * 1024), 64 * 1024 * 1024))
    except Exception:  # pragma: no cover - conservative fallback
        return 32 * 1024 * 1024


def _pick_tile(batch: int, dim: int, itemsize: int, vmem_limit_bytes: int,
               tm_request) -> tuple[int, int]:
    """Choose (tile_rows, num_tiles) for the batch axis."""
    # ~60% of the scoped-VMEM limit for the double-buffered X tiles; the
    # weight, output slab and f32 dot result are tiny by comparison.
    input_budget = (vmem_limit_bytes * 3) // 5
    max_tm = max(8, (input_budget // (2 * dim * itemsize)) // 8 * 8)

    if tm_request is None:
        # Target ~4 MiB per X tile so per-grid-step overhead is amortized.
        tm_request = max(128, (4 << 20) // (dim * itemsize))
    tm = max(8, min(int(tm_request), max_tm))

    batch8 = _round_up(batch, 8)
    if tm >= batch8:
        return batch8, 1  # whole batch in a single tile

    # Multi-tile: prefer lane-friendly (multiple-of-128) tile heights.
    if max_tm >= 128:
        tm = max(128, (tm // 128) * 128)
    num_tiles = _cdiv(batch, tm)

    # Prefer an even tile count so the "parallel" axis splits evenly across
    # v7x's two TensorCores (no-op on v5e/v6e single-core chips).
    if num_tiles % 2 == 1:
        for nt_target in (num_tiles + 1, num_tiles - 1):
            if nt_target < 2:
                continue
            for gran in (128, 8):
                cand = _round_up(_cdiv(batch, nt_target), gran)
                cand = max(8, min(cand, max_tm))
                nt = _cdiv(batch, cand)
                if nt % 2 == 0:
                    return cand, nt
    return tm, num_tiles


def _matvec_kernel(x_ref, w_ref, o_ref):
    # x_ref: (TM, dim) X tile (edge tile rows beyond `batch` are masked/garbage
    #        but only affect their own discarded outputs).
    # w_ref: (8, dim) weight row replicated over sublanes, resident in VMEM.
    # o_ref: (1, 8, TM) output slab for this tile.
    # W @ X^T on the otherwise-idle MXU with f32 accumulation (attention-style
    # transposed-RHS contraction).  All 8 result rows are identical; storing
    # the full (8, TM) slab keeps every store an unmasked, lane-dense vreg.
    res = lax.dot_general(
        w_ref[...], x_ref[...],
        dimension_numbers=(((1,), (1,)), ((), ())),
        preferred_element_type=jnp.float32,
    )  # (8, TM)
    o_ref[...] = res[None].astype(o_ref.dtype)


def linear_model_forward(x: jax.Array, w: jax.Array, *, tm=None,
                         vmem_limit_bytes=None,
                         force_kernel: bool = False) -> jax.Array:
    """Pallas equivalent of `X @ w` for X:(batch, dim), w:(dim,) -> (batch,)."""
    batch, dim = x.shape
    assert w.shape == (dim,)
    w = jnp.asarray(w, x.dtype)
    itemsize = x.dtype.itemsize

    # Tiny shapes: pallas_call dispatch overhead dominates — just use XLA.
    if not force_kernel and batch * dim * itemsize < (1 << 20):
        return x @ w

    if vmem_limit_bytes is None:
        vmem_limit_bytes = _default_vmem_limit()

    tm_eff, num_tiles = _pick_tile(batch, dim, itemsize, vmem_limit_bytes, tm)

    # Weight row replicated over 8 sublanes (tiny; resident across the grid).
    w_rep = jnp.broadcast_to(w.reshape(1, dim), (8, dim))

    cost = pl.CostEstimate(
        flops=2 * batch * dim,
        transcendentals=0,
        bytes_accessed=int(itemsize * (batch * dim + 8 * dim
                                       + 8 * num_tiles * tm_eff)),
    )

    out = pl.pallas_call(
        _matvec_kernel,
        out_shape=jax.ShapeDtypeStruct((num_tiles, 8, tm_eff), x.dtype),
        grid=(num_tiles,),
        in_specs=[
            pl.BlockSpec((tm_eff, dim), lambda i: (i, 0)),  # X tiles (no pad copy)
            pl.BlockSpec((8, dim), lambda i: (0, 0)),       # weight, VMEM-resident
        ],
        out_specs=pl.BlockSpec((1, 8, tm_eff), lambda i: (i, 0, 0)),
        compiler_params=pltpu.CompilerParams(
            dimension_semantics=("parallel",),
            vmem_limit_bytes=int(vmem_limit_bytes),
        ),
        cost_estimate=cost,
    )(x, w_rep)

    # Row 0 of each tile slab holds the results; drop the masked-edge tail.
    return out[:, 0, :].reshape(-1)[:batch]


if __name__ == "__main__":
    key = jax.random.PRNGKey(0)
    k_x, k_w, k_x2, k_w2 = jax.random.split(key, 4)

    def rel_err(a, b):
        return float(jnp.linalg.norm(a - b) / (jnp.linalg.norm(b) + 1e-12))

    # Small shapes consistent with the module: X (batch, dim), w (dim,).
    batch, dim = 8, 32
    x = jax.random.normal(k_x, (batch, dim), dtype=jnp.float32)
    w = jax.random.normal(k_w, (dim,), dtype=jnp.float32)
    y = linear_model_forward(x, w, force_kernel=True)  # exercise the kernel path
    jax.block_until_ready(y)
    y_ref = jnp.matmul(x, w, precision=lax.Precision.HIGHEST)
    assert y.shape == (batch,)
    # Tolerance budgets for reduced-precision MXU passes; real indexing bugs
    # would produce O(1) relative error.
    assert rel_err(y, y_ref) < 1e-2, rel_err(y, y_ref)

    # Multi-tile grid with batch % tile != 0: exercises the masked edge block
    # (no jnp.pad of X anywhere) and the even tile split for v7x.
    batch2, dim2 = 1040, 256
    x2 = jax.random.normal(k_x2, (batch2, dim2), dtype=jnp.float32)
    w2 = jax.random.normal(k_w2, (dim2,), dtype=jnp.float32)
    y2 = linear_model_forward(x2, w2, tm=512)
    jax.block_until_ready(y2)
    y2_ref = jnp.matmul(x2, w2, precision=lax.Precision.HIGHEST)
    assert y2.shape == (batch2,)
    assert rel_err(y2, y2_ref) < 1e-2, rel_err(y2, y2_ref)

    print("KERNEL_OK")
</pallas_src>

<mosaic_0001>
module attributes {stable_mosaic.version = 11 : i64} {
  func.func @_matvec_kernel(%arg0: i32, %arg1: memref<8x32xf32, #tpu.memory_space<vmem>>, %arg2: memref<8x32xf32, #tpu.memory_space<vmem>>, %arg3: memref<1x8x8xf32, #tpu.memory_space<vmem>>) attributes {dimension_semantics = [#tpu.dimension_semantics<parallel>], iteration_bounds = array<i64: 1>, scalar_prefetch = 0 : i64, scratch_operands = 0 : i64, tpu.core_type = #tpu.core_type<tc>, window_params = [{transform_indices = @transform_0, window_bounds = array<i64: 8, 32>}, {pipeline_mode = #tpu.pipeline_mode<synchronous>, transform_indices = @transform_1, window_bounds = array<i64: 8, 32>}, {transform_indices = @transform_2, window_bounds = array<i64: 1, 8, 8>}]} {
    %c0 = arith.constant 0 : index
    %c0_0 = arith.constant 0 : index
    %0 = vector.load %arg2[%c0, %c0_0] : memref<8x32xf32, #tpu.memory_space<vmem>>, vector<8x32xf32>
    %c0_1 = arith.constant 0 : index
    %c0_2 = arith.constant 0 : index
    %1 = vector.load %arg1[%c0_1, %c0_2] : memref<8x32xf32, #tpu.memory_space<vmem>>, vector<8x32xf32>
    %cst = arith.constant dense<0.000000e+00> : vector<8x8xf32>
    %2 = tpu.matmul %0, %1, %cst {dimension_numbers = #tpu.dot_dimension_numbers<[1], [1], [0], [0], [0, 0, 1, 0], [], []>} : vector<8x32xf32>, vector<8x32xf32>, vector<8x8xf32> -> vector<8x8xf32>
    %3 = vector.shape_cast %2 : vector<8x8xf32> to vector<1x8x8xf32>
    %c0_3 = arith.constant 0 : index
    %c0_4 = arith.constant 0 : index
    %c0_5 = arith.constant 0 : index
    %4 = vector.load %arg3[%c0_3, %c0_4, %c0_5] : memref<1x8x8xf32, #tpu.memory_space<vmem>>, vector<1x8x8xf32>
    tpu.vector_store %arg3[%c0_3, %c0_4, %c0_5], %3 {strides = array<i32>} : memref<1x8x8xf32, #tpu.memory_space<vmem>>, vector<1x8x8xf32>,
    return
  }
  func.func @transform_0(%arg0: i32) -> (i32, i32) {
    %c0_i32 = arith.constant 0 : i32
    %c0_i32_0 = arith.constant 0 : i32
    return %arg0, %c0_i32 : i32, i32
  }
  func.func @transform_1(%arg0: i32) -> (i32, i32) {
    %c0_i32 = arith.constant 0 : i32
    %c0_i32_0 = arith.constant 0 : i32
    %c0_i32_1 = arith.constant 0 : i32
    return %c0_i32, %c0_i32_0 : i32, i32
  }
  func.func @transform_2(%arg0: i32) -> (i32, i32, i32) {
    %c0_i32 = arith.constant 0 : i32
    %c0_i32_0 = arith.constant 0 : i32
    %c0_i32_1 = arith.constant 0 : i32
    return %arg0, %c0_i32, %c0_i32_0 : i32, i32, i32
  }
}

</mosaic_0001>

<bundles_post_ra>
// kernel: tpu_custom_call.1
= control target key start
LH: loop header
LB: loop body
LE: loop exit
PB: predicated region body
PF: predicated region fallthrough
CT: control target
= control target key end

     0   :  { %7 = vsyncpa [#allocation3], 0  ;;  %s242_s0 = inlined_call_operand.hbm [shape: f32[8,32], index: 0, kind: input, shape index: {}]   ;;  %s243_s1 = inlined_call_operand.hbm [shape: f32[8,32], index: 1, kind: input, shape index: {}]   ;;  %s244_s2 = inlined_call_operand.hbm [shape: f32[1,8,8], index: 2, kind: output, shape index: {}]  }
   0x1   :  { %8 = vsyncpa [#allocation6], 0 }
   0x2   :  { %9 = vsyncpa [#allocation4], 0  ;;  %s213_s9 = smov [#allocation2]   ;;  %s214_s11 = smov [#allocation5]  }
   0x3   :  { %s16_s10 = sshll.u32 %s213_s9, 4  ;;  %s26_s12 = sshll.u32 %s214_s11, 4  ;;  %s17_s10 = int_to_ptr.vmem [resolvable:$true] %s16_s10  ;;  %s27_s12 = int_to_ptr.vmem [resolvable:$true] %s26_s12 }
   0x4   :  { %s155_s13 = scalar_lea.vmem %s17_s10, 128  ;;  %p160_p1 = scmp.lt.s32.totalorder %s17_s10, %s17_s10 }
   0x5   :  { %p156_p0 = scmp.ne.s32.totalorder %s17_s10, %s155_s13  ;;  %p161_p2 = scmp.lt.s32.totalorder %s155_s13, %s155_s13 }
   0x7   :  { %p162_p3 = por %p161_p2, %p160_p1 }
   0x9   :  { %p163_p4 = pnand %p162_p3, %p156_p0 }
   0xb   :  { %166 = shalt.err (!%p163_p4)
}
   0xc   :  { %19 = dma.hbm_to_vmem [thread:$0]  %s242_s0, 128, %s17_s10, [#allocation3]  }
   0xd   :  { %s175_s16 = scalar_lea.vmem %s27_s12, 128  ;;  %p180_p6 = scmp.lt.s32.totalorder %s27_s12, %s27_s12 }
   0xe   :  { %p176_p5 = scmp.ne.s32.totalorder %s27_s12, %s175_s16  ;;  %p181_p7 = scmp.lt.s32.totalorder %s175_s16, %s175_s16 }
  0x10   :  { %p182_p8 = por %p181_p7, %p180_p6 }
  0x12   :  { %p183_p9 = pnand %p182_p8, %p176_p5 }
  0x14   :  { %186 = shalt.err (!%p183_p9)
}
  0x15   :  { %29 = dma.hbm_to_vmem [thread:$0]  %s243_s1, 128, %s27_s12, [#allocation6]  }
  0x16   :  { %207 = dma.done.wait [#allocation3], 128  }
  0x17   :  { %208 = vsyncadd [#allocation3], 4294967168 }
  0x18   :  { %209 = dma.done.wait [#allocation6], 128  }
  0x19   :  { %210 = vsyncadd [#allocation6], 4294967168  ;;  %v215_v0 = vmov 0.0   ;;  %vm216_vm0 = vmmov 0   ;;  %vm38_vm1 = vcmask 261120   ;;  %v37_v1 = vld [vmem:[#allocation2] sm:$0xff] }
  0x1a   :  { %137 = vmatprep.subr.mxu0 %v215_v0  ;;  %139 = vmatprep.mubr.msk.f32.mxu0 %vm216_vm0, %v215_v0  ;;  %v36_v2 = vld [vmem:[#allocation5] sm:$0xff]  ;;  %s217_s0 = smov [#allocation7]   ;;  %vm115_vm2 = vcmask 64512  }
  0x1b   :  { %138 = vmatpush3.xpose.msk.msra.mxu0 %vm38_vm1, %v37_v1  ;;  %s123_s19 = sshll.u32 %s217_s0, 4  ;;  %s124_s19 = int_to_ptr.vmem [resolvable:$true] %s123_s19 }
  0x1c   :  { %s187_s1 = scalar_lea.vmem %s124_s19, 128  ;;  %p192_p11 = scmp.lt.s32.totalorder %s124_s19, %s124_s19 }
  0x1d   :  { %p188_p10 = scmp.ne.s32.totalorder %s124_s19, %s187_s1  ;;  %p193_p12 = scmp.lt.s32.totalorder %s187_s1, %s187_s1 }
  0x1e   :  { %140 = vmatmul.mubr.msk.f32.vlgmr.msra.gmra.mxu0 %vm38_vm1, %v36_v2 }
  0x1f   :  { %p194_p13 = por %p193_p12, %p192_p11 }
  0x21   :  { %p195_p0 = pnand %p194_p13, %p188_p10 }
  0xde   :  { %v111_v3 = vpop.f32.mrf.mxu0 }
  0xdf   :  { %116 = vst.msk [vmem:[#allocation7] sm:$0xff] %vm115_vm2, %v111_v3 }
  0xe0   :  { %v141_v4 = vpop.f32.mrf.mxu0 }
  0xe1   :  { %198 = shalt.err (!%p195_p0)
}
  0xe2   :  { %126 = dma.vmem_to_hbm [thread:$0]  %s124_s19, 128, %s244_s2, [#allocation4]  }
  0xe3   :  { %211 = dma.done.wait [#allocation4], 128  }
  0xe4   :  { %212 = vsyncadd [#allocation4], 4294967168 }
  0xe5   :  { %130 = vsyncpa [#allocation3], 1 }
  0xe6   :  { %131 = vsyncpa [#allocation6], 1 }
  0xe7   :  { %132 = vsyncpa [#allocation4], 1 }

</bundles_post_ra>
